<compile_context>
chip_gen: v5e
topology: v5e:2x2
jax: 0.10.0
libtpu: 0.0.40
codegen_flags: <defaults>
</compile_context>

<pallas_src>
import functools

import jax
import jax.numpy as jnp
from jax.experimental import pallas as pl
from jax.experimental.pallas import tpu as pltpu

HIDDEN = 256

# ---- chip-dependent static knobs (decided once at import) -------------------
try:
    _DEVICE_KIND = jax.devices()[0].device_kind.lower()
except Exception:  # pragma: no cover - defensive; default backend is TPU
    _DEVICE_KIND = ""
_IS_V5 = "v5" in _DEVICE_KIND
_IS_V7 = "v7" in _DEVICE_KIND
_USE_BF16_EPILOGUE = not _IS_V5      # v5e VPU has no bf16 VALU
_MAX_TB = 512 if _IS_V7 else 1024    # v7x: 2 TCs -> smaller tiles so grid splits


def _round_up(x, m):
    return ((x + m - 1) // m) * m


# ---- kernel ------------------------------------------------------------------
def actor_kernel(x_ref,
                 w1_ref, b1_ref,
                 w2_ref, b2_ref,
                 w3_ref, b3_ref,
                 w4_ref, b4_ref,
                 out_ref, *, bf16_epilogue):
    """Fused 4-layer MLP.  4 MXU matmuls (bf16 in, f32 acc), bias+ReLU epilogue
    on the VPU (bf16 on v6e/v7x, f32 on v5e), one lane-dense f32 store."""

    def layer(x, w_ref, b_ref):
        acc = jnp.dot(x, w_ref[...], preferred_element_type=jnp.float32) + b_ref[...]
        if bf16_epilogue:
            return jnp.maximum(acc.astype(jnp.bfloat16), jnp.bfloat16(0.0))
        return jnp.maximum(acc, 0.0).astype(jnp.bfloat16)

    h = layer(x_ref[...], w1_ref, b1_ref)
    h = layer(h, w2_ref, b2_ref)
    h = layer(h, w3_ref, b3_ref)
    # Final layer: zero-padded to a multiple of 128 lanes -> unmasked vst.
    out_ref[...] = (
        jnp.dot(h, w4_ref[...], preferred_element_type=jnp.float32) + b4_ref[...]
    )


# ---- wrapper -----------------------------------------------------------------
@functools.partial(jax.jit, static_argnames=("action_dim",))
def actor_forward(state, params, *, action_dim):
    """state: (B, state_dim) f32/bf16.  params: pre-transposed bf16 weights and
    f32 (1, fan_out) biases with w4/b4 lane-padded.  Returns (mean, log_std)."""
    b, state_dim = state.shape
    out_dim = 2 * action_dim
    out_dim_pad = params["w4"].shape[1]          # round_up(2*action_dim, 128)

    # Balanced batch tiles: multiple of 16 rows, no oversized padding tile.
    n_tiles = max(1, pl.cdiv(b, _MAX_TB))
    tb = _round_up(pl.cdiv(b, n_tiles), 16)
    b_pad = n_tiles * tb

    # Pre-cast input to bf16 (halves input DMA, removes in-kernel cast).
    state = state.astype(jnp.bfloat16)
    if b_pad != b:
        state = jnp.pad(state, ((0, b_pad - b), (0, 0)))

    # Cost hint so XLA schedules surrounding glue freely.
    flops = 2 * b_pad * (state_dim * HIDDEN + 2 * HIDDEN * HIDDEN
                         + HIDDEN * out_dim_pad)
    bytes_weights = sum(int(params[k].size) * params[k].dtype.itemsize
                        for k in ("w1", "w2", "w3", "w4",
                                  "b1", "b2", "b3", "b4"))
    bytes_io = b_pad * state_dim * 2 + b_pad * out_dim_pad * 4
    cost = pl.CostEstimate(flops=int(flops), transcendentals=0,
                           bytes_accessed=int(bytes_weights + bytes_io))

    # Weights/biases: full blocks with constant block index -> VMEM-resident
    # across all grid steps (no per-tile re-fetch).
    const = lambda shape: pl.BlockSpec(shape, lambda i: (0, 0))
    in_specs = [
        pl.BlockSpec((tb, state_dim), lambda i: (i, 0)),            # state tile
        const((state_dim, HIDDEN)),  const((1, HIDDEN)),            # w1, b1
        const((HIDDEN, HIDDEN)),     const((1, HIDDEN)),            # w2, b2
        const((HIDDEN, HIDDEN)),     const((1, HIDDEN)),            # w3, b3
        const((HIDDEN, out_dim_pad)), const((1, out_dim_pad)),      # w4, b4
    ]

    kernel = functools.partial(actor_kernel, bf16_epilogue=_USE_BF16_EPILOGUE)

    out = pl.pallas_call(
        kernel,
        out_shape=jax.ShapeDtypeStruct((b_pad, out_dim_pad), jnp.float32),
        grid=(n_tiles,),
        in_specs=in_specs,
        out_specs=pl.BlockSpec((tb, out_dim_pad), lambda i: (i, 0)),
        compiler_params=pltpu.CompilerParams(
            dimension_semantics=("parallel",)),
        cost_estimate=cost,
    )(state,
      params["w1"], params["b1"],
      params["w2"], params["b2"],
      params["w3"], params["b3"],
      params["w4"], params["b4"])

    # Strip batch/lane padding and do chunk(2, dim=-1) in the wrapper (free).
    mean = out[:b, :action_dim]
    log_std = out[:b, action_dim:out_dim]
    return mean, log_std


# ---- parameter construction ----------------------------------------------------
def init_params(key, state_dim, action_dim):
    """Deterministic synthetic init (PyTorch-Linear-like uniform fan-in).
    Weights pre-transposed to (in, out) bf16; biases f32 (1, out).
    Final layer zero-padded to a lane-dense multiple of 128 columns."""
    out_dim = 2 * action_dim
    out_dim_pad = _round_up(out_dim, 128)
    dims = [(state_dim, HIDDEN), (HIDDEN, HIDDEN), (HIDDEN, HIDDEN),
            (HIDDEN, out_dim)]
    params = {}
    for i, (fan_in, fan_out) in enumerate(dims, start=1):
        key, kw, kb = jax.random.split(key, 3)
        bound = 1.0 / jnp.sqrt(jnp.float32(fan_in))
        w = jax.random.uniform(kw, (fan_in, fan_out), jnp.float32, -bound, bound)
        b_ = jax.random.uniform(kb, (1, fan_out), jnp.float32, -bound, bound)
        if i == 4:  # lane-pad the narrow output layer with zeros
            w = jnp.pad(w, ((0, 0), (0, out_dim_pad - fan_out)))
            b_ = jnp.pad(b_, ((0, 0), (0, out_dim_pad - fan_out)))
        params[f"w{i}"] = w.astype(jnp.bfloat16)
        params[f"b{i}"] = b_
    return params


# ---- pure-JAX reference (same bf16-weight / f32-accumulate math) ---------------
def actor_forward_ref(state, params, action_dim):
    h = state.astype(jnp.bfloat16)
    for i in range(1, 4):
        h = jnp.dot(h, params[f"w{i}"],
                    preferred_element_type=jnp.float32) + params[f"b{i}"]
        h = jnp.maximum(h, 0.0).astype(jnp.bfloat16)
    out = jnp.dot(h, params["w4"],
                  preferred_element_type=jnp.float32) + params["b4"]
    return out[:, :action_dim], out[:, action_dim:2 * action_dim]


if __name__ == "__main__":
    key = jax.random.PRNGKey(0)
    batch, state_dim, action_dim = 2, 8, 4

    kp, ks = jax.random.split(key)
    params = init_params(kp, state_dim, action_dim)
    state = jax.random.normal(ks, (batch, state_dim), jnp.float32)

    mean, log_std = actor_forward(state, params, action_dim=action_dim)
    jax.block_until_ready((mean, log_std))

    mean_ref, log_std_ref = actor_forward_ref(state, params, action_dim)
    assert mean.shape == (batch, action_dim)
    assert log_std.shape == (batch, action_dim)
    assert jnp.allclose(mean, mean_ref, atol=2e-2, rtol=2e-2)
    assert jnp.allclose(log_std, log_std_ref, atol=2e-2, rtol=2e-2)

    # Also exercise a batch spanning multiple balanced grid tiles (padded rows).
    big_state = jax.random.normal(ks, (2000, state_dim), jnp.float32)
    bm, bs = actor_forward(big_state, params, action_dim=action_dim)
    jax.block_until_ready((bm, bs))
    bm_ref, bs_ref = actor_forward_ref(big_state, params, action_dim)
    assert bm.shape == (2000, action_dim) and bs.shape == (2000, action_dim)
    assert jnp.allclose(bm, bm_ref, atol=2e-2, rtol=2e-2)
    assert jnp.allclose(bs, bs_ref, atol=2e-2, rtol=2e-2)

    print("KERNEL_OK")
</pallas_src>

<mosaic_0001>
module attributes {stable_mosaic.version = 11 : i64} {
  func.func @actor_kernel(%arg0: i32, %arg1: memref<16x8xbf16, #tpu.memory_space<vmem>>, %arg2: memref<8x256xbf16, #tpu.memory_space<vmem>>, %arg3: memref<1x256xf32, #tpu.memory_space<vmem>>, %arg4: memref<256x256xbf16, #tpu.memory_space<vmem>>, %arg5: memref<1x256xf32, #tpu.memory_space<vmem>>, %arg6: memref<256x256xbf16, #tpu.memory_space<vmem>>, %arg7: memref<1x256xf32, #tpu.memory_space<vmem>>, %arg8: memref<256x128xbf16, #tpu.memory_space<vmem>>, %arg9: memref<1x128xf32, #tpu.memory_space<vmem>>, %arg10: memref<16x128xf32, #tpu.memory_space<vmem>>) attributes {dimension_semantics = [#tpu.dimension_semantics<parallel>], iteration_bounds = array<i64: 1>, scalar_prefetch = 0 : i64, scratch_operands = 0 : i64, tpu.core_type = #tpu.core_type<tc>, window_params = [{transform_indices = @transform_0, window_bounds = array<i64: 16, 8>}, {pipeline_mode = #tpu.pipeline_mode<synchronous>, transform_indices = @transform_1, window_bounds = array<i64: 8, 256>}, {pipeline_mode = #tpu.pipeline_mode<synchronous>, transform_indices = @transform_2, window_bounds = array<i64: 1, 256>}, {pipeline_mode = #tpu.pipeline_mode<synchronous>, transform_indices = @transform_3, window_bounds = array<i64: 256, 256>}, {pipeline_mode = #tpu.pipeline_mode<synchronous>, transform_indices = @transform_4, window_bounds = array<i64: 1, 256>}, {pipeline_mode = #tpu.pipeline_mode<synchronous>, transform_indices = @transform_5, window_bounds = array<i64: 256, 256>}, {pipeline_mode = #tpu.pipeline_mode<synchronous>, transform_indices = @transform_6, window_bounds = array<i64: 1, 256>}, {pipeline_mode = #tpu.pipeline_mode<synchronous>, transform_indices = @transform_7, window_bounds = array<i64: 256, 128>}, {pipeline_mode = #tpu.pipeline_mode<synchronous>, transform_indices = @transform_8, window_bounds = array<i64: 1, 128>}, {transform_indices = @transform_9, window_bounds = array<i64: 16, 128>}]} {
    %c0 = arith.constant 0 : index
    %c0_0 = arith.constant 0 : index
    %0 = vector.load %arg1[%c0, %c0_0] : memref<16x8xbf16, #tpu.memory_space<vmem>>, vector<16x8xbf16>
    %c0_1 = arith.constant 0 : index
    %c0_2 = arith.constant 0 : index
    %1 = vector.load %arg2[%c0_1, %c0_2] : memref<8x256xbf16, #tpu.memory_space<vmem>>, vector<8x256xbf16>
    %cst = arith.constant dense<0.000000e+00> : vector<16x256xf32>
    %2 = tpu.matmul %0, %1, %cst {dimension_numbers = #tpu.dot_dimension_numbers<[1], [0], [0], [1], [0, 0, 1, 1], [], []>} : vector<16x8xbf16>, vector<8x256xbf16>, vector<16x256xf32> -> vector<16x256xf32>
    %c0_3 = arith.constant 0 : index
    %c0_4 = arith.constant 0 : index
    %3 = vector.load %arg3[%c0_3, %c0_4] : memref<1x256xf32, #tpu.memory_space<vmem>>, vector<1x256xf32>
    %4 = vector.broadcast %3 : vector<1x256xf32> to vector<16x256xf32>
    %5 = arith.addf %2, %4 : vector<16x256xf32>
    %6 = arith.truncf %5 : vector<16x256xf32> to vector<16x256xbf16>
    %cst_5 = arith.constant 0.000000e+00 : bf16
    %7 = vector.broadcast %cst_5 : bf16 to vector<16x256xbf16>
    %8 = arith.maximumf %6, %7 : vector<16x256xbf16>
    %c0_6 = arith.constant 0 : index
    %c0_7 = arith.constant 0 : index
    %9 = vector.load %arg4[%c0_6, %c0_7] : memref<256x256xbf16, #tpu.memory_space<vmem>>, vector<256x256xbf16>
    %cst_8 = arith.constant dense<0.000000e+00> : vector<16x256xf32>
    %10 = tpu.matmul %8, %9, %cst_8 {dimension_numbers = #tpu.dot_dimension_numbers<[1], [0], [0], [1], [0, 0, 1, 1], [], []>} : vector<16x256xbf16>, vector<256x256xbf16>, vector<16x256xf32> -> vector<16x256xf32>
    %c0_9 = arith.constant 0 : index
    %c0_10 = arith.constant 0 : index
    %11 = vector.load %arg5[%c0_9, %c0_10] : memref<1x256xf32, #tpu.memory_space<vmem>>, vector<1x256xf32>
    %12 = vector.broadcast %11 : vector<1x256xf32> to vector<16x256xf32>
    %13 = arith.addf %10, %12 : vector<16x256xf32>
    %14 = arith.truncf %13 : vector<16x256xf32> to vector<16x256xbf16>
    %cst_11 = arith.constant 0.000000e+00 : bf16
    %15 = vector.broadcast %cst_11 : bf16 to vector<16x256xbf16>
    %16 = arith.maximumf %14, %15 : vector<16x256xbf16>
    %c0_12 = arith.constant 0 : index
    %c0_13 = arith.constant 0 : index
    %17 = vector.load %arg6[%c0_12, %c0_13] : memref<256x256xbf16, #tpu.memory_space<vmem>>, vector<256x256xbf16>
    %cst_14 = arith.constant dense<0.000000e+00> : vector<16x256xf32>
    %18 = tpu.matmul %16, %17, %cst_14 {dimension_numbers = #tpu.dot_dimension_numbers<[1], [0], [0], [1], [0, 0, 1, 1], [], []>} : vector<16x256xbf16>, vector<256x256xbf16>, vector<16x256xf32> -> vector<16x256xf32>
    %c0_15 = arith.constant 0 : index
    %c0_16 = arith.constant 0 : index
    %19 = vector.load %arg7[%c0_15, %c0_16] : memref<1x256xf32, #tpu.memory_space<vmem>>, vector<1x256xf32>
    %20 = vector.broadcast %19 : vector<1x256xf32> to vector<16x256xf32>
    %21 = arith.addf %18, %20 : vector<16x256xf32>
    %22 = arith.truncf %21 : vector<16x256xf32> to vector<16x256xbf16>
    %cst_17 = arith.constant 0.000000e+00 : bf16
    %23 = vector.broadcast %cst_17 : bf16 to vector<16x256xbf16>
    %24 = arith.maximumf %22, %23 : vector<16x256xbf16>
    %c0_18 = arith.constant 0 : index
    %c0_19 = arith.constant 0 : index
    %25 = vector.load %arg8[%c0_18, %c0_19] : memref<256x128xbf16, #tpu.memory_space<vmem>>, vector<256x128xbf16>
    %cst_20 = arith.constant dense<0.000000e+00> : vector<16x128xf32>
    %26 = tpu.matmul %24, %25, %cst_20 {dimension_numbers = #tpu.dot_dimension_numbers<[1], [0], [0], [1], [0, 0, 1, 1], [], []>} : vector<16x256xbf16>, vector<256x128xbf16>, vector<16x128xf32> -> vector<16x128xf32>
    %c0_21 = arith.constant 0 : index
    %c0_22 = arith.constant 0 : index
    %27 = vector.load %arg9[%c0_21, %c0_22] : memref<1x128xf32, #tpu.memory_space<vmem>>, vector<1x128xf32>
    %28 = vector.broadcast %27 : vector<1x128xf32> to vector<16x128xf32>
    %29 = arith.addf %26, %28 : vector<16x128xf32>
    %c0_23 = arith.constant 0 : index
    %c0_24 = arith.constant 0 : index
    %30 = vector.load %arg10[%c0_23, %c0_24] : memref<16x128xf32, #tpu.memory_space<vmem>>, vector<16x128xf32>
    tpu.vector_store %arg10[%c0_23, %c0_24], %29 {strides = array<i32>} : memref<16x128xf32, #tpu.memory_space<vmem>>, vector<16x128xf32>,
    return
  }
  func.func @transform_0(%arg0: i32) -> (i32, i32) {
    %c0_i32 = arith.constant 0 : i32
    %c0_i32_0 = arith.constant 0 : i32
    return %arg0, %c0_i32 : i32, i32
  }
  func.func @transform_1(%arg0: i32) -> (i32, i32) {
    %c0_i32 = arith.constant 0 : i32
    %c0_i32_0 = arith.constant 0 : i32
    %c0_i32_1 = arith.constant 0 : i32
    return %c0_i32, %c0_i32_0 : i32, i32
  }
  func.func @transform_2(%arg0: i32) -> (i32, i32) {
    %c0_i32 = arith.constant 0 : i32
    %c0_i32_0 = arith.constant 0 : i32
    %c0_i32_1 = arith.constant 0 : i32
    return %c0_i32, %c0_i32_0 : i32, i32
  }
  func.func @transform_3(%arg0: i32) -> (i32, i32) {
    %c0_i32 = arith.constant 0 : i32
    %c0_i32_0 = arith.constant 0 : i32
    %c0_i32_1 = arith.constant 0 : i32
    return %c0_i32, %c0_i32_0 : i32, i32
  }
  func.func @transform_4(%arg0: i32) -> (i32, i32) {
    %c0_i32 = arith.constant 0 : i32
    %c0_i32_0 = arith.constant 0 : i32
    %c0_i32_1 = arith.constant 0 : i32
    return %c0_i32, %c0_i32_0 : i32, i32
  }
  func.func @transform_5(%arg0: i32) -> (i32, i32) {
    %c0_i32 = arith.constant 0 : i32
    %c0_i32_0 = arith.constant 0 : i32
    %c0_i32_1 = arith.constant 0 : i32
    return %c0_i32, %c0_i32_0 : i32, i32
  }
  func.func @transform_6(%arg0: i32) -> (i32, i32) {
    %c0_i32 = arith.constant 0 : i32
    %c0_i32_0 = arith.constant 0 : i32
    %c0_i32_1 = arith.constant 0 : i32
    return %c0_i32, %c0_i32_0 : i32, i32
  }
  func.func @transform_7(%arg0: i32) -> (i32, i32) {
    %c0_i32 = arith.constant 0 : i32
    %c0_i32_0 = arith.constant 0 : i32
    %c0_i32_1 = arith.constant 0 : i32
    return %c0_i32, %c0_i32_0 : i32, i32
  }
  func.func @transform_8(%arg0: i32) -> (i32, i32) {
    %c0_i32 = arith.constant 0 : i32
    %c0_i32_0 = arith.constant 0 : i32
    %c0_i32_1 = arith.constant 0 : i32
    return %c0_i32, %c0_i32_0 : i32, i32
  }
  func.func @transform_9(%arg0: i32) -> (i32, i32) {
    %c0_i32 = arith.constant 0 : i32
    %c0_i32_0 = arith.constant 0 : i32
    return %arg0, %c0_i32 : i32, i32
  }
}

</mosaic_0001>

<bundles_post_ra>
// kernel: actor_forward.1
= control target key start
LH: loop header
LB: loop body
LE: loop exit
PB: predicated region body
PF: predicated region fallthrough
CT: control target
= control target key end

     0   :  { %14 = vsyncpa [#allocation3], 0  ;;  %s1435_s0 = inlined_call_operand.vmem [shape: bf16[16,8], index: 0, kind: input, shape index: {}]   ;;  %s1436_s1 = inlined_call_operand.vmem [shape: bf16[8,256], index: 1, kind: input, shape index: {}]   ;;  %s1437_s2 = inlined_call_operand.vmem [shape: f32[1,256], index: 2, kind: input, shape index: {}]   ;;  %s1438_s3 = inlined_call_operand.hbm [shape: bf16[256,256], index: 3, kind: input, shape index: {}]   ;;  %s1439_s4 = inlined_call_operand.vmem [shape: f32[1,256], index: 4, kind: input, shape index: {}]   ;;  %s1440_s5 = inlined_call_operand.hbm [shape: bf16[256,256], index: 5, kind: input, shape index: {}]   ;;  %s1441_s6 = inlined_call_operand.vmem [shape: f32[1,256], index: 6, kind: input, shape index: {}]   ;;  %s1442_s7 = inlined_call_operand.hbm [shape: bf16[256,128], index: 7, kind: input, shape index: {}]   ;;  %s1443_s8 = inlined_call_operand.vmem [shape: f32[1,128], index: 8, kind: input, shape index: {}]   ;;  %s1444_s9 = inlined_call_operand.vmem [shape: f32[16,128], index: 9, kind: output, shape index: {}]  }
   0x1   :  { %15 = vsyncpa [#allocation5], 0  ;;  %s41_s11 = sshll.u32 %s1440_s5, 4  ;;  %s1341_s12 = smov [#allocation4]   ;;  %s42_s11 = int_to_ptr.hbm [resolvable:$true] %s41_s11 }
   0x2   :  { %s43_s13 = sshll.u32 %s1341_s12, 4  ;;  %s26_s16 = sshll.u32 %s1438_s3, 4  ;;  %s44_s13 = int_to_ptr.vmem [resolvable:$true] %s43_s13  ;;  %s27_s16 = int_to_ptr.hbm [resolvable:$true] %s26_s16 }
   0x3   :  { %s1342_s17 = smov 128   ;;  %s1343_s18 = smov 8  }
   0x4   :  { %49 = dma.hbm_to_vmem [thread:$0]  %s42_s11, 4096, %s44_s13, [#allocation5], %s1342_s17, %s1342_s17, %s1343_s18  }
   0x5   :  { %s1344_s19 = smov [#allocation2]   ;;  %s56_s23 = sshll.u32 %s1442_s7, 4  ;;  %s57_s23 = int_to_ptr.hbm [resolvable:$true] %s56_s23 }
   0x6   :  { %s28_s20 = sshll.u32 %s1344_s19, 4  ;;  %s1345_s5 = smov [#allocation6]   ;;  %s29_s20 = int_to_ptr.vmem [resolvable:$true] %s28_s20 }
   0x7   :  { %34 = dma.hbm_to_vmem [thread:$0]  %s27_s16, 4096, %s29_s20, [#allocation3], %s1342_s17, %s1342_s17, %s1343_s18  }
   0x8   :  { %s58_s24 = sshll.u32 %s1345_s5, 4  ;;  %s1346_s25 = smov 64   ;;  %s59_s24 = int_to_ptr.vmem [resolvable:$true] %s58_s24 }
   0x9   :  { %s1347_s26 = smov 4  }
   0xa   :  { %64 = dma.hbm_to_vmem [thread:$0]  %s57_s23, 2048, %s59_s24, [#allocation5], %s1346_s25, %s1346_s25, %s1347_s26  }
   0xb   :  { %1337 = dma.done.wait [#allocation3], 4096  }
   0xc   :  { %1338 = vsyncadd [#allocation3], 4294963200 }
   0xd   :  { %1339 = dma.done.wait [#allocation5], 6144  }
   0xe   :  { %1340 = vsyncadd [#allocation5], 4294961152  ;;  %v82_v0 = vld [vmem:[%s1436_s1] sm:$0xff]  ;;  %vm103_vm0 = vcmask 1043456   ;;  %vm99_vm1 = vcmask 64512  }
   0xf   :  { %v914_v1 = vld [vmem:[#allocation2 + $0x70] sm:$0xf]  ;;  %v95_v2 = vunpack.c.l.b16 %v82_v0  ;;  %v96_v3 = vunpack.c.h.b16 %v82_v0  ;;  %v1192_v4 = vld [vmem:[#allocation2 + $0x74] sm:$0xf0]  ;;  %v1191_v9 = vld [vmem:[#allocation2 + $0x74] sm:$0xf] }
  0x10   :  { %v978_v5 = vld [vmem:[#allocation2 + $0xf0] sm:$0xf]  ;;  %v1208_v6 = vld [vmem:[#allocation2 + $0xf4] sm:$0xf0]  ;;  %v915_v7 = vor.u32 %v1192_v4, %v914_v1  ;;  %v916_v10 = vld [vmem:[#allocation2 + $0x78] sm:$0xf0] }
  0x11   :  { %v979_v8 = vor.u32 %v1208_v6, %v978_v5  ;;  %v1207_v11 = vld [vmem:[#allocation2 + $0xf4] sm:$0xf]  ;;  %v97_v12 = vpack.c.b16 %v95_v2, %v95_v2  ;;  %v98_v13 = vpack.c.b16 %v96_v3, %v96_v3  ;;  %v1176_v14 = vld [vmem:[%s1435_s0] sm:$0xff]  ;;  %v919_v15 = vor.u32 %v1191_v9, %v916_v10  ;;  %v980_v16 = vld [vmem:[#allocation2 + $0xf8] sm:$0xf0] }
  0x12   :  { %v906_v17 = vld [vmem:[#allocation2 + $0x60] sm:$0xf]  ;;  %v1190_v18 = vld [vmem:[#allocation2 + $0x64] sm:$0xf0]  ;;  %348 = vmatpush.bf16.msra.mxu2 %v915_v7  ;;  %v983_v19 = vor.u32 %v1207_v11, %v980_v16  ;;  %v1189_v23 = vld [vmem:[#allocation2 + $0x64] sm:$0xf] }
  0x13   :  { %362 = vmatpush.bf16.msra.mxu3 %v979_v8  ;;  %v907_v20 = vor.u32 %v1190_v18, %v906_v17  ;;  %v970_v21 = vld [vmem:[#allocation2 + $0xe0] sm:$0xf]  ;;  %v1206_v22 = vld [vmem:[#allocation2 + $0xe4] sm:$0xf0]  ;;  %v105_v24 = vsel %vm103_vm0, %v97_v12, 0  ;;  %v108_v25 = vsel %vm103_vm0, %v98_v13, 0 }
  0x14   :  { %v971_v26 = vor.u32 %v1206_v22, %v970_v21  ;;  %v908_v27 = vld [vmem:[#allocation2 + $0x68] sm:$0xf0]  ;;  %v1205_v28 = vld [vmem:[#allocation2 + $0xe4] sm:$0xf]  ;;  %117 = vmatpush.bf16.msra.mxu0 %v105_v24  ;;  %131 = vmatpush.bf16.msra.mxu1 %v108_v25  ;;  %v898_v30 = vld [vmem:[#allocation2 + $0x50] sm:$0xf] }
  0x15   :  { %v972_v29 = vld [vmem:[#allocation2 + $0xe8] sm:$0xf0]  ;;  %v1188_v31 = vld [vmem:[#allocation2 + $0x54] sm:$0xf0]  ;;  %v911_v32 = vor.u32 %v1189_v23, %v908_v27  ;;  %v962_v34 = vld [vmem:[#allocation2 + $0xd0] sm:$0xf] }
  0x16   :  { %v975_v33 = vor.u32 %v1205_v28, %v972_v29  ;;  %v1204_v35 = vld [vmem:[#allocation2 + $0xd4] sm:$0xf0]  ;;  %v1187_v36 = vld [vmem:[#allocation2 + $0x54] sm:$0xf]  ;;  %349 = vmatpush.bf16.msra.mxu2 %v907_v20  ;;  %v899_v37 = vor.u32 %v1188_v31, %v898_v30  ;;  %v900_v39 = vld [vmem:[#allocation2 + $0x58] sm:$0xf0] }
  0x17   :  { %363 = vmatpush.bf16.msra.mxu3 %v971_v26  ;;  %v963_v38 = vor.u32 %v1204_v35, %v962_v34  ;;  %v1203_v40 = vld [vmem:[#allocation2 + $0xd4] sm:$0xf]  ;;  %v964_v41 = vld [vmem:[#allocation2 + $0xd8] sm:$0xf0]  ;;  %854 = vmatmul.msk.bf16.vlgmr.msra.gmra.mxu0 %vm99_vm1, %v1176_v14  ;;  %v890_v42 = vld [vmem:[#allocation2 + $0x40] sm:$0xf]  ;;  %v903_v46 = vor.u32 %v1187_v36, %v900_v39 }
  0x18   :  { %376 = vmatpush.bf16.msrb.mxu0 %v919_v15  ;;  %390 = vmatpush.bf16.msrb.mxu1 %v983_v19  ;;  %v1186_v43 = vld [vmem:[#allocation2 + $0x44] sm:$0xf0]  ;;  %v954_v44 = vld [vmem:[#allocation2 + $0xc0] sm:$0xf]  ;;  %v967_v47 = vor.u32 %v1203_v40, %v964_v41  ;;  %v1185_v48 = vld [vmem:[#allocation2 + $0x44] sm:$0xf] }
  0x19   :  { %855 = vmatmul.msk.bf16.vlgmr.msra.gmra.mxu1 %vm99_vm1, %v1176_v14  ;;  %v1202_v45 = vld [vmem:[#allocation2 + $0xc4] sm:$0xf0]  ;;  %v892_v49 = vld [vmem:[#allocation2 + $0x48] sm:$0xf0]  ;;  %v891_v50 = vor.u32 %v1186_v43, %v890_v42  ;;  %v1201_v52 = vld [vmem:[#allocation2 + $0xc4] sm:$0xf] }
  0x1a   :  { %350 = vmatpush.bf16.msra.mxu2 %v899_v37  ;;  %v955_v51 = vor.u32 %v1202_v45, %v954_v44  ;;  %v956_v53 = vld [vmem:[#allocation2 + $0xc8] sm:$0xf0]  ;;  %v895_v54 = vor.u32 %v1185_v48, %v892_v49  ;;  %v882_v56 = vld [vmem:[#allocation2 + $0x30] sm:$0xf]  ;;  %v1184_v57 = vld [vmem:[#allocation2 + $0x34] sm:$0xf0] }
  0x1b   :  { %364 = vmatpush.bf16.msra.mxu3 %v963_v38  ;;  %v959_v55 = vor.u32 %v1201_v52, %v956_v53  ;;  %v946_v58 = vld [vmem:[#allocation2 + $0xb0] sm:$0xf]  ;;  %v883_v59 = vor.u32 %v1184_v57, %v882_v56  ;;  %v1200_v60 = vld [vmem:[#allocation2 + $0xb4] sm:$0xf0]  ;;  %v1183_v61 = vld [vmem:[#allocation2 + $0x34] sm:$0xf] }
  0x1c   :  { %377 = vmatpush.bf16.msrb.mxu0 %v911_v32  ;;  %391 = vmatpush.bf16.msrb.mxu1 %v975_v33  ;;  %v884_v62 = vld [vmem:[#allocation2 + $0x38] sm:$0xf0]  ;;  %v947_v63 = vor.u32 %v1200_v60, %v946_v58  ;;  %v1199_v1 = vld [vmem:[#allocation2 + $0xb4] sm:$0xf]  ;;  %v874_v4 = vld [vmem:[#allocation2 + $0x20] sm:$0xf] }
  0x1d   :  { %v887_v0 = vor.u32 %v1183_v61, %v884_v62  ;;  %v948_v2 = vld [vmem:[#allocation2 + $0xb8] sm:$0xf0]  ;;  %v1182_v5 = vld [vmem:[#allocation2 + $0x24] sm:$0xf0]  ;;  %v938_v7 = vld [vmem:[#allocation2 + $0xa0] sm:$0xf] }
  0x1e   :  { %351 = vmatpush.bf16.msra.mxu2 %v891_v50  ;;  %v951_v3 = vor.u32 %v1199_v1, %v948_v2  ;;  %v875_v6 = vor.u32 %v1182_v5, %v874_v4  ;;  %v1198_v8 = vld [vmem:[#allocation2 + $0xa4] sm:$0xf0]  ;;  %v1181_v9 = vld [vmem:[#allocation2 + $0x24] sm:$0xf]  ;;  %v876_v11 = vld [vmem:[#allocation2 + $0x28] sm:$0xf0] }
  0x1f   :  { %365 = vmatpush.bf16.msra.mxu3 %v955_v51  ;;  %v939_v10 = vor.u32 %v1198_v8, %v938_v7  ;;  %v1197_v12 = vld [vmem:[#allocation2 + $0xa4] sm:$0xf]  ;;  %v940_v13 = vld [vmem:[#allocation2 + $0xa8] sm:$0xf0]  ;;  %v879_v14 = vor.u32 %v1181_v9, %v876_v11  ;;  %v866_v16 = vld [vmem:[#allocation2 + $0x10] sm:$0xf] }
  0x20   :  { %378 = vmatpush.bf16.msrb.mxu0 %v903_v46  ;;  %392 = vmatpush.bf16.msrb.mxu1 %v967_v47  ;;  %v943_v15 = vor.u32 %v1197_v12, %v940_v13  ;;  %v1180_v17 = vld [vmem:[#allocation2 + $0x14] sm:$0xf0]  ;;  %v930_v18 = vld [vmem:[#allocation2 + $0x90] sm:$0xf]  ;;  %v1179_v21 = vld [vmem:[#allocation2 + $0x14] sm:$0xf] }
  0x21   :  { %v867_v19 = vor.u32 %v1180_v17, %v866_v16  ;;  %v1196_v20 = vld [vmem:[#allocation2 + $0x94] sm:$0xf0]  ;;  %v868_v22 = vld [vmem:[#allocation2 + $0x18] sm:$0xf0]  ;;  %v1195_v25 = vld [vmem:[#allocation2 + $0x94] sm:$0xf] }
  0x22   :  { %352 = vmatpush.bf16.msra.mxu2 %v883_v59  ;;  %v931_v23 = vor.u32 %v1196_v20, %v930_v18  ;;  %v871_v24 = vor.u32 %v1179_v21, %v868_v22  ;;  %v932_v26 = vld [vmem:[#allocation2 + $0x98] sm:$0xf0]  ;;  %v858_v28 = vld [vmem:[#allocation2] sm:$0xf]  ;;  %v1178_v29 = vld [vmem:[#allocation2 + $0x4] sm:$0xf0] }
  0x23   :  { %366 = vmatpush.bf16.msra.mxu3 %v947_v63  ;;  %v935_v27 = vor.u32 %v1195_v25, %v932_v26  ;;  %v922_v30 = vld [vmem:[#allocation2 + $0x80] sm:$0xf]  ;;  %v859_v31 = vor.u32 %v1178_v29, %v858_v28  ;;  %v1194_v32 = vld [vmem:[#allocation2 + $0x84] sm:$0xf0]  ;;  %v1177_v33 = vld [vmem:[#allocation2 + $0x4] sm:$0xf] }
  0x24   :  { %379 = vmatpush.bf16.msrb.mxu0 %v895_v54  ;;  %393 = vmatpush.bf16.msrb.mxu1 %v959_v55  ;;  %v860_v34 = vld [vmem:[#allocation2 + $0x8] sm:$0xf0]  ;;  %v923_v35 = vor.u32 %v1194_v32, %v922_v30  ;;  %v1193_v37 = vld [vmem:[#allocation2 + $0x84] sm:$0xf]  ;;  %v1106_v40 = vld [vmem:[#allocation4 + $0xf0] sm:$0xf] }
  0x25   :  { %v863_v36 = vor.u32 %v1177_v33, %v860_v34  ;;  %v924_v38 = vld [vmem:[#allocation2 + $0x88] sm:$0xf0]  ;;  %v1240_v41 = vld [vmem:[#allocation4 + $0xf4] sm:$0xf0]  ;;  %v1239_v42 = vld [vmem:[#allocation4 + $0xf4] sm:$0xf] }
  0x26   :  { %353 = vmatpush.bf16.msra.mxu2 %v875_v6  ;;  %v927_v39 = vor.u32 %v1193_v37, %v924_v38  ;;  %v1107_v43 = vor.u32 %v1240_v41, %v1106_v40  ;;  %v1108_v44 = vld [vmem:[#allocation4 + $0xf8] sm:$0xf0]  ;;  %v1098_v45 = vld [vmem:[#allocation4 + $0xe0] sm:$0xf]  ;;  %v1238_v46 = vld [vmem:[#allocation4 + $0xe4] sm:$0xf0] }
  0x27   :  { %367 = vmatpush.bf16.msra.mxu3 %v939_v10  ;;  %v1111_v47 = vor.u32 %v1239_v42, %v1108_v44  ;;  %v1237_v48 = vld [vmem:[#allocation4 + $0xe4] sm:$0xf]  ;;  %v1100_v49 = vld [vmem:[#allocation4 + $0xe8] sm:$0xf0]  ;;  %v1042_v50 = vld [vmem:[#allocation4 + $0x70] sm:$0xf]  ;;  %v1099_v51 = vor.u32 %v1238_v46, %v1098_v45 }
  0x28   :  { %380 = vmatpush.bf16.msrb.mxu0 %v887_v0  ;;  %394 = vmatpush.bf16.msrb.mxu1 %v951_v3  ;;  %v1224_v52 = vld [vmem:[#allocation4 + $0x74] sm:$0xf0]  ;;  %v1223_v53 = vld [vmem:[#allocation4 + $0x74] sm:$0xf]  ;;  %v1044_v54 = vld [vmem:[#allocation4 + $0x78] sm:$0xf0]  ;;  %v1103_v55 = vor.u32 %v1237_v48, %v1100_v49 }
  0x29   :  { %v1043_v56 = vor.u32 %v1224_v52, %v1042_v50  ;;  %v1047_v57 = vor.u32 %v1223_v53, %v1044_v54  ;;  %v1090_v58 = vld [vmem:[#allocation4 + $0xd0] sm:$0xf]  ;;  %v1236_v59 = vld [vmem:[#allocation4 + $0xd4] sm:$0xf0]  ;;  %v1235_v60 = vld [vmem:[#allocation4 + $0xd4] sm:$0xf] }
  0x2a   :  { %354 = vmatpush.bf16.msra.mxu2 %v867_v19  ;;  %v1092_v61 = vld [vmem:[#allocation4 + $0xd8] sm:$0xf0]  ;;  %v1034_v62 = vld [vmem:[#allocation4 + $0x60] sm:$0xf]  ;;  %v1222_v63 = vld [vmem:[#allocation4 + $0x64] sm:$0xf0]  ;;  %v1091_v3 = vor.u32 %v1236_v59, %v1090_v58 }
  0x2b   :  { %368 = vmatpush.bf16.msra.mxu3 %v931_v23  ;;  %v1035_v0 = vor.u32 %v1222_v63, %v1034_v62  ;;  %v1221_v1 = vld [vmem:[#allocation4 + $0x64] sm:$0xf]  ;;  %v1036_v2 = vld [vmem:[#allocation4 + $0x68] sm:$0xf0]  ;;  %v1095_v5 = vor.u32 %v1235_v60, %v1092_v61  ;;  %v1082_v6 = vld [vmem:[#allocation4 + $0xc0] sm:$0xf] }
  0x2c   :  { %381 = vmatpush.bf16.msrb.mxu0 %v879_v14  ;;  %395 = vmatpush.bf16.msrb.mxu1 %v943_v15  ;;  %v1039_v4 = vor.u32 %v1221_v1, %v1036_v2  ;;  %v1234_v7 = vld [vmem:[#allocation4 + $0xc4] sm:$0xf0]  ;;  %v1233_v8 = vld [vmem:[#allocation4 + $0xc4] sm:$0xf]  ;;  %v1084_v9 = vld [vmem:[#allocation4 + $0xc8] sm:$0xf0] }
  0x2d   :  { %v1083_v10 = vor.u32 %v1234_v7, %v1082_v6  ;;  %v1087_v11 = vor.u32 %v1233_v8, %v1084_v9  ;;  %v83_v12 = vld [vmem:[%s1437_s2] sm:$0x3]  ;;  %v1026_v29 = vld [vmem:[#allocation4 + $0x50] sm:$0xf]  ;;  %v1220_v30 = vld [vmem:[#allocation4 + $0x54] sm:$0xf0] }
  0x2e   :  { %355 = vmatpush.bf16.msra.mxu2 %v859_v31  ;;  %v85_v15 = vperm.slane %v83_v12, 0  ;;  %v86_v16 = vperm.slane %v83_v12, 1  ;;  %v1219_v31 = vld [vmem:[#allocation4 + $0x54] sm:$0xf]  ;;  %v1027_v32 = vor.u32 %v1220_v30, %v1026_v29  ;;  %v1028_v33 = vld [vmem:[#allocation4 + $0x58] sm:$0xf0] }
  0x2f   :  { %369 = vmatpush.bf16.msra.mxu3 %v923_v35  ;;  %v1031_v34 = vor.u32 %v1219_v31, %v1028_v33  ;;  %v1074_v35 = vld [vmem:[#allocation4 + $0xb0] sm:$0xf]  ;;  %v1231_v37 = vld [vmem:[#allocation4 + $0xb4] sm:$0xf]  ;;  %v1018_v41 = vld [vmem:[#allocation4 + $0x40] sm:$0xf] }
  0x30   :  { %382 = vmatpush.bf16.msrb.mxu0 %v871_v24  ;;  %396 = vmatpush.bf16.msrb.mxu1 %v935_v27  ;;  %v1218_v42 = vld [vmem:[#allocation4 + $0x44] sm:$0xf0]  ;;  %v1020_v45 = vld [vmem:[#allocation4 + $0x48] sm:$0xf0]  ;;  %v1229_v49 = vld [vmem:[#allocation4 + $0xa4] sm:$0xf] }
  0x31   :  { %v1019_v44 = vor.u32 %v1218_v42, %v1018_v41  ;;  %v1230_v48 = vld [vmem:[#allocation4 + $0xa4] sm:$0xf0]  ;;  %v1010_v53 = vld [vmem:[#allocation4 + $0x30] sm:$0xf]  ;;  %v1216_v54 = vld [vmem:[#allocation4 + $0x34] sm:$0xf0] }
  0x32   :  { %614 = vmatpush.bf16.msrb.mxu2 %v1043_v56  ;;  %v1215_v56 = vld [vmem:[#allocation4 + $0x34] sm:$0xf]  ;;  %v1058_v59 = vld [vmem:[#allocation4 + $0x90] sm:$0xf]  ;;  %v1228_v60 = vld [vmem:[#allocation4 + $0x94] sm:$0xf0] }
  0x33   :  { %628 = vmatpush.bf16.msrb.mxu3 %v1107_v43  ;;  %v1217_v43 = vld [vmem:[#allocation4 + $0x44] sm:$0xf]  ;;  %v1227_v61 = vld [vmem:[#allocation4 + $0x94] sm:$0xf]  ;;  %v1059_v62 = vor.u32 %v1228_v60, %v1058_v59  ;;  %v1060_v63 = vld [vmem:[#allocation4 + $0x98] sm:$0xf0] }
  0x34   :  { %383 = vmatpush.bf16.msrb.mxu0 %v863_v36  ;;  %397 = vmatpush.bf16.msrb.mxu1 %v927_v39  ;;  %v1232_v36 = vld [vmem:[#allocation4 + $0xb4] sm:$0xf0]  ;;  %v1076_v39 = vld [vmem:[#allocation4 + $0xb8] sm:$0xf0]  ;;  %v1023_v46 = vor.u32 %v1217_v43, %v1020_v45  ;;  %v1002_v1 = vld [vmem:[#allocation4 + $0x20] sm:$0xf] }
  0x35   :  { %v1075_v38 = vor.u32 %v1232_v36, %v1074_v35  ;;  %v1079_v40 = vor.u32 %v1231_v37, %v1076_v39  ;;  %v1214_v2 = vld [vmem:[#allocation4 + $0x24] sm:$0xf0]  ;;  %v1050_v7 = vld [vmem:[#allocation4 + $0x80] sm:$0xf]  ;;  %v1225_v9 = vld [vmem:[#allocation4 + $0x84] sm:$0xf] }
  0x36   :  { %615 = vmatpush.bf16.msrb.mxu2 %v1035_v0  ;;  %v1063_v0 = vor.u32 %v1227_v61, %v1060_v63  ;;  %v1226_v8 = vld [vmem:[#allocation4 + $0x84] sm:$0xf0]  ;;  %v1251_v59 = vld [vmem:[#allocation6 + $0x50] sm:$0xff]  ;;  %v1244_v60 = vld [vmem:[#allocation6 + $0x18] sm:$0xff] }
  0x37   :  { %629 = vmatpush.bf16.msrb.mxu3 %v1099_v51  ;;  %v1068_v51 = vld [vmem:[#allocation4 + $0xa8] sm:$0xf0]  ;;  %v1249_v63 = vld [vmem:[#allocation6 + $0x40] sm:$0xff] }
  0x38   :  { %656 = vmatpush.bf16.msra.mxu1 %v1111_v47  ;;  %642 = vmatpush.bf16.msra.mxu0 %v1047_v57  ;;  %v1066_v47 = vld [vmem:[#allocation4 + $0xa0] sm:$0xf]  ;;  %v1071_v52 = vor.u32 %v1229_v49, %v1068_v51  ;;  %v1012_v57 = vld [vmem:[#allocation4 + $0x38] sm:$0xf0]  ;;  %v1250_v61 = vld [vmem:[#allocation6 + $0x48] sm:$0xff] }
  0x39   :  { %v1067_v50 = vor.u32 %v1230_v48, %v1066_v47  ;;  %v1015_v58 = vor.u32 %v1215_v56, %v1012_v57  ;;  %v1246_v56 = vld [vmem:[#allocation6 + $0x28] sm:$0xff]  ;;  %v1252_v57 = vld [vmem:[#allocation6 + $0x58] sm:$0xff] }
  0x3a   :  { %616 = vmatpush.bf16.msrb.mxu2 %v1027_v32 }
  0x3b   :  { %630 = vmatpush.bf16.msrb.mxu3 %v1091_v3  ;;  %v1213_v3 = vld [vmem:[#allocation4 + $0x24] sm:$0xf] }
  0x3c   :  { %657 = vmatpush.bf16.msra.mxu1 %v1103_v55  ;;  %643 = vmatpush.bf16.msra.mxu0 %v1039_v4  ;;  %v1011_v55 = vor.u32 %v1216_v54, %v1010_v53  ;;  %v1003_v4 = vor.u32 %v1214_v2, %v1002_v1  ;;  %v1254_v53 = vld [vmem:[#allocation6 + $0x68] sm:$0xff]  ;;  %v1247_v54 = vld [vmem:[#allocation6 + $0x30] sm:$0xff]  ;;  %v1241_v1 = vld [vmem:[#allocation6] sm:$0xff] }
  0x3d   :  { %v448_v2 = vld [vmem:[%s1441_s6] sm:$0x3] }
  0x3e   :  { %617 = vmatpush.bf16.msrb.mxu2 %v1019_v44 }
  0x3f   :  { %631 = vmatpush.bf16.msrb.mxu3 %v1083_v10  ;;  %v1051_v10 = vor.u32 %v1226_v8, %v1050_v7 }
  0x40   :  { %658 = vmatpush.bf16.msra.mxu1 %v1095_v5  ;;  %644 = vmatpush.bf16.msra.mxu0 %v1031_v34  ;;  %v1004_v5 = vld [vmem:[#allocation4 + $0x28] sm:$0xf0] }
  0x41   :  { %v1007_v6 = vor.u32 %v1213_v3, %v1004_v5  ;;  %v451_v5 = vperm.slane %v448_v2, 1 }
  0x42   :  { %618 = vmatpush.bf16.msrb.mxu2 %v1011_v55  ;;  %v1253_v55 = vld [vmem:[#allocation6 + $0x60] sm:$0xff] }
  0x43   :  { %632 = vmatpush.bf16.msrb.mxu3 %v1075_v38 }
  0x44   :  { %659 = vmatpush.bf16.msra.mxu1 %v1087_v11  ;;  %645 = vmatpush.bf16.msra.mxu0 %v1023_v46  ;;  %v1052_v11 = vld [vmem:[#allocation4 + $0x88] sm:$0xf0] }
  0x45   :  { %v1055_v12 = vor.u32 %v1225_v9, %v1052_v11  ;;  %v450_v9 = vperm.slane %v448_v2, 0 }
  0x46   :  { %619 = vmatpush.bf16.msrb.mxu2 %v1003_v4 }
  0x47   :  { %633 = vmatpush.bf16.msrb.mxu3 %v1067_v50 }
  0x48   :  { %660 = vmatpush.bf16.msra.mxu1 %v1079_v40  ;;  %646 = vmatpush.bf16.msra.mxu0 %v1015_v58  ;;  %v1245_v58 = vld [vmem:[#allocation6 + $0x20] sm:$0xff] }
  0x4b   :  { %634 = vmatpush.bf16.msrb.mxu3 %v1059_v62  ;;  %v1243_v62 = vld [vmem:[#allocation6 + $0x10] sm:$0xff] }
  0x4c   :  { %661 = vmatpush.bf16.msra.mxu1 %v1071_v52  ;;  %647 = vmatpush.bf16.msra.mxu0 %v1007_v6 }
  0x4f   :  { %635 = vmatpush.bf16.msrb.mxu3 %v1051_v10 }
  0x50   :  { %662 = vmatpush.bf16.msra.mxu1 %v1063_v0  ;;  %v1242_v0 = vld [vmem:[#allocation6 + $0x8] sm:$0xff] }
  0x54   :  { %663 = vmatpush.bf16.msra.mxu1 %v1055_v12 }
  0x94   :  { %v119_v13 = vpop.f32.mrf.mxu0 }
  0x95   :  { %v120_v17 = vadd.f32 %v119_v13, %v85_v15  ;;  %v994_v13 = vld [vmem:[#allocation4 + $0x10] sm:$0xf] }
  0x96   :  { %v133_v14 = vpop.f32.mrf.mxu1 }
  0x97   :  { %v134_v18 = vadd.f32 %v133_v14, %v86_v16  ;;  %v144_v23 = vmax.f32 %v120_v17, 0.0  ;;  %v1212_v14 = vld [vmem:[#allocation4 + $0x14] sm:$0xf0]  ;;  %v996_v17 = vld [vmem:[#allocation4 + $0x18] sm:$0xf0] }
  0x99   :  { %v145_v24 = vmax.f32 %v134_v18, 0.0 }
  0x9c   :  { %v121_v19 = vpop.f32.mrf.mxu0 }
  0x9d   :  { %v122_v21 = vadd.f32 %v121_v19, %v85_v15  ;;  %v1211_v15 = vld [vmem:[#allocation4 + $0x14] sm:$0xf]  ;;  %v986_v19 = vld [vmem:[#allocation4] sm:$0xf] }
  0x9e   :  { %v135_v20 = vpop.f32.mrf.mxu1  ;;  %v999_v18 = vor.u32 %v1211_v15, %v996_v17 }
  0x9f   :  { %v136_v22 = vadd.f32 %v135_v20, %v86_v16  ;;  %v146_v25 = vmax.f32 %v122_v21, 0.0  ;;  %v995_v16 = vor.u32 %v1212_v14, %v994_v13  ;;  %v1210_v20 = vld [vmem:[#allocation4 + $0x4] sm:$0xf0]  ;;  %v1209_v21 = vld [vmem:[#allocation4 + $0x4] sm:$0xf] }
  0xa0   :  { %648 = vmatpush.bf16.msra.mxu0 %v999_v18 }
  0xa1   :  { %v147_v26 = vmax.f32 %v136_v22, 0.0  ;;  %v148_v27 = vpack.c.bf16 %v146_v25, %v144_v23  ;;  %620 = vmatpush.bf16.msrb.mxu2 %v995_v16  ;;  %v987_v22 = vor.u32 %v1210_v20, %v986_v19  ;;  %v988_v23 = vld [vmem:[#allocation4 + $0x8] sm:$0xf0]  ;;  %v1256_v25 = vld [vmem:[#allocation6 + $0x78] sm:$0xff] }
  0xa3   :  { %v149_v28 = vpack.c.bf16 %v147_v26, %v145_v24  ;;  %356 = vmatmul.bf16.vlgmr.msra.gmra.mxu2 %v148_v27  ;;  %384 = vmatmul.bf16.vlgmr.msrb.gmra.mxu0 %v148_v27  ;;  %v991_v24 = vor.u32 %v1209_v21, %v988_v23  ;;  %v1248_v26 = vld [vmem:[#allocation6 + $0x38] sm:$0xff]  ;;  %v1255_v27 = vld [vmem:[#allocation6 + $0x70] sm:$0xff] }
  0xa5   :  { %370 = vmatmul.bf16.vlgmr.msra.gmra.mxu3 %v149_v28  ;;  %398 = vmatmul.bf16.vlgmr.msrb.gmra.mxu1 %v149_v28  ;;  %v182_v28 = vld [vmem:[%s1439_s4] sm:$0x3] }
  0xa6   :  { %621 = vmatpush.bf16.msrb.mxu2 %v987_v22  ;;  %649 = vmatpush.bf16.msra.mxu0 %v991_v24  ;;  %v185_v31 = vperm.slane %v182_v28, 1  ;;  %v184_v35 = vperm.slane %v182_v28, 0 }
  0xa7   :  { %828 = vmatpush.bf16.msra.mxu3 %v1256_v25 }
  0xaa   :  { %814 = vmatpush.bf16.msra.mxu2 %v1248_v26 }
  0xab   :  { %829 = vmatpush.bf16.msra.mxu3 %v1255_v27  ;;  %v1264_v27 = vld [vmem:[%s1443_s8] ss:$0 sm:$0xff] }
  0xae   :  { %815 = vmatpush.bf16.msra.mxu2 %v1247_v54 }
  0xaf   :  { %830 = vmatpush.bf16.msra.mxu3 %v1254_v53 }
  0xb2   :  { %816 = vmatpush.bf16.msra.mxu2 %v1246_v56 }
  0xb3   :  { %831 = vmatpush.bf16.msra.mxu3 %v1253_v55 }
  0xb6   :  { %817 = vmatpush.bf16.msra.mxu2 %v1245_v58 }
  0xb7   :  { %832 = vmatpush.bf16.msra.mxu3 %v1252_v57 }
  0xba   :  { %818 = vmatpush.bf16.msra.mxu2 %v1244_v60 }
  0xbb   :  { %833 = vmatpush.bf16.msra.mxu3 %v1251_v59 }
  0xbe   :  { %819 = vmatpush.bf16.msra.mxu2 %v1243_v62 }
  0xbf   :  { %834 = vmatpush.bf16.msra.mxu3 %v1250_v61 }
  0xc2   :  { %820 = vmatpush.bf16.msra.mxu2 %v1242_v0 }
  0xc3   :  { %835 = vmatpush.bf16.msra.mxu3 %v1249_v63 }
  0xc6   :  { %821 = vmatpush.bf16.msra.mxu2 %v1241_v1 }
 0x120   :  { %v385_v29 = vpop.f32.mrf.mxu0 }
 0x121   :  { %v386_v32 = vadd.f32 %v385_v29, %v185_v31 }
 0x122   :  { %v399_v30 = vpop.f32.mrf.mxu1 }
 0x123   :  { %v400_v37 = vadd.f32 %v399_v30, %v386_v32 }
 0x125   :  { %v411_v42 = vmax.f32 %v400_v37, 0.0 }
 0x126   :  { %v357_v33 = vpop.f32.mrf.mxu2 }
 0x127   :  { %v358_v39 = vadd.f32 %v357_v33, %v184_v35 }
 0x128   :  { %v371_v34 = vpop.f32.mrf.mxu3  ;;  %v387_v36 = vpop.f32.mrf.mxu0 }
 0x129   :  { %v388_v38 = vadd.f32 %v387_v36, %v185_v31  ;;  %v372_v45 = vadd.f32 %v371_v34, %v358_v39 }
 0x12a   :  { %v401_v40 = vpop.f32.mrf.mxu1 }
 0x12b   :  { %v402_v41 = vadd.f32 %v401_v40, %v388_v38  ;;  %v410_v50 = vmax.f32 %v372_v45, 0.0 }
 0x12d   :  { %v413_v43 = vmax.f32 %v402_v41, 0.0 }
 0x12e   :  { %v359_v44 = vpop.f32.mrf.mxu2 }
 0x12f   :  { %v360_v46 = vadd.f32 %v359_v44, %v184_v35  ;;  %v415_v47 = vpack.c.bf16 %v413_v43, %v411_v42 }
 0x130   :  { %v373_v48 = vpop.f32.mrf.mxu3 }
 0x131   :  { %v374_v49 = vadd.f32 %v373_v48, %v360_v46  ;;  %636 = vmatmul.bf16.vlgmr.msrb.gmra.mxu3 %v415_v47  ;;  %664 = vmatmul.bf16.vlgmr.msra.gmra.mxu1 %v415_v47 }
 0x133   :  { %v412_v51 = vmax.f32 %v374_v49, 0.0 }
 0x135   :  { %v414_v52 = vpack.c.bf16 %v412_v51, %v410_v50 }
 0x137   :  { %622 = vmatmul.bf16.vlgmr.msrb.gmra.mxu2 %v414_v52  ;;  %650 = vmatmul.bf16.vlgmr.msra.gmra.mxu0 %v414_v52 }
 0x1ae   :  { %v665_v3 = vpop.f32.mrf.mxu1 }
 0x1b4   :  { %v651_v4 = vpop.f32.mrf.mxu0  ;;  %v637_v7 = vpop.f32.mrf.mxu3 }
 0x1b5   :  { %v652_v6 = vadd.f32 %v651_v4, %v451_v5 }
 0x1b6   :  { %v667_v13 = vpop.f32.mrf.mxu1 }
 0x1b7   :  { %v666_v11 = vadd.f32 %v665_v3, %v652_v6 }
 0x1b9   :  { %v677_v16 = vmax.f32 %v666_v11, 0.0 }
 0x1ba   :  { %v623_v8 = vpop.f32.mrf.mxu2 }
 0x1bb   :  { %v624_v14 = vadd.f32 %v623_v8, %v450_v9 }
 0x1bc   :  { %v653_v10 = vpop.f32.mrf.mxu0  ;;  %v639_v22 = vpop.f32.mrf.mxu3 }
 0x1bd   :  { %v654_v12 = vadd.f32 %v653_v10, %v451_v5  ;;  %v638_v19 = vadd.f32 %v637_v7, %v624_v14 }
 0x1bf   :  { %v668_v15 = vadd.f32 %v667_v13, %v654_v12  ;;  %v676_v24 = vmax.f32 %v638_v19, 0.0 }
 0x1c1   :  { %v679_v17 = vmax.f32 %v668_v15, 0.0 }
 0x1c2   :  { %v625_v18 = vpop.f32.mrf.mxu2 }
 0x1c3   :  { %v681_v20 = vpack.c.bf16 %v679_v17, %v677_v16  ;;  %v626_v21 = vadd.f32 %v625_v18, %v450_v9 }
 0x1c5   :  { %v640_v23 = vadd.f32 %v639_v22, %v626_v21  ;;  %836 = vmatmul.bf16.vlgmr.msra.gmra.mxu3 %v681_v20 }
 0x1c7   :  { %v678_v25 = vmax.f32 %v640_v23, 0.0 }
 0x1c9   :  { %v680_v26 = vpack.c.bf16 %v678_v25, %v676_v24 }
 0x1cb   :  { %822 = vmatmul.bf16.vlgmr.msra.gmra.mxu2 %v680_v26 }
 0x248   :  { %v837_v28 = vpop.f32.mrf.mxu3 }
 0x24e   :  { %v823_v29 = vpop.f32.mrf.mxu2 }
 0x24f   :  { %v824_v30 = vadd.f32 %v1264_v27, %v823_v29 }
 0x250   :  { %v839_v34 = vpop.f32.mrf.mxu3 }
 0x251   :  { %v838_v31 = vadd.f32 %v837_v28, %v824_v30 }
 0x253   :  { %842 = vst [vmem:[%s1444_s9] sm:$0xff] %v838_v31 }
 0x256   :  { %v825_v32 = vpop.f32.mrf.mxu2 }
 0x257   :  { %v826_v33 = vadd.f32 %v1264_v27, %v825_v32 }
 0x259   :  { %v840_v35 = vadd.f32 %v839_v34, %v826_v33 }
 0x25b   :  { %843 = vst [vmem:[%s1444_s9 + $0x8] sm:$0xff] %v840_v35 }
 0x25c   :  { %848 = vsyncpa [#allocation3], 1 }
 0x25d   :  { %849 = vsyncpa [#allocation5], 1 }

</bundles_post_ra>
